<compile_context>
chip_gen: v6e
topology: v6e:2x2x1
jax: 0.10.0
libtpu: 0.0.40
codegen_flags: <defaults>
</compile_context>

<pallas_src>
import jax
import jax.numpy as jnp
from jax.experimental import pallas as pl
from jax.experimental.pallas import tpu as pltpu

DIM_IN, DIM_HID, DIM_OUT = 11, 10, 13


def mlp_kernel(xt_ref, w1_ref, w2_ref, w3_ref, o_ref):
    """Full forward pass on one feature-major batch tile, entirely in VMEM.

    xt_ref : (DIM_IN, TB)         activations, batch on the lane axis
    w1_ref : (DIM_HID, DIM_IN+1)  torch-layout weight with bias as last column
    w2_ref : (DIM_HID, DIM_HID+1)
    w3_ref : (DIM_OUT, DIM_HID+1)
    o_ref  : (DIM_OUT, TB)        softmax probabilities
    """
    x = xt_ref[...]

    # lin1 + sigmoid  (h: (DIM_HID, TB), f32 accumulation)
    h = jnp.dot(w1_ref[:, :DIM_IN], x, preferred_element_type=jnp.float32)
    h = h + w1_ref[:, DIM_IN:DIM_IN + 1].astype(jnp.float32)
    h = 1.0 / (1.0 + jnp.exp(-h))                  # exact sigmoid; exp -> EUP

    # lin2 + sigmoid
    h = jnp.dot(w2_ref[:, :DIM_HID], h.astype(w2_ref.dtype),
                preferred_element_type=jnp.float32)
    h = h + w2_ref[:, DIM_HID:DIM_HID + 1].astype(jnp.float32)
    h = 1.0 / (1.0 + jnp.exp(-h))

    # lin3 + numerically-stable softmax over the class (sublane) axis
    logits = jnp.dot(w3_ref[:, :DIM_HID], h.astype(w3_ref.dtype),
                     preferred_element_type=jnp.float32)
    logits = logits + w3_ref[:, DIM_HID:DIM_HID + 1].astype(jnp.float32)

    m = jnp.max(logits, axis=0, keepdims=True)     # XLU cross-sublane reduce
    e = jnp.exp(logits - m)                        # EUP
    denom = jnp.sum(e, axis=0, keepdims=True)      # XLU
    # Exact normalization: rows must sum to 1 (approx vrcp was ~3e-3 off).
    o_ref[...] = (e / denom).astype(o_ref.dtype)


def nn_genre_classifier_forward(x, params, *, batch_tile=4096):
    """x: (N, DIM_IN).  params: torch-layout w* (out, in) and b* (out,).

    Returns (N, DIM_OUT) softmax probabilities in x.dtype.  The wrapper pads the
    batch to a tile multiple and slices the padded rows back off.
    """
    n, din = x.shape
    assert din == DIM_IN
    assert batch_tile % 128 == 0, "batch_tile must be a multiple of 128 (lane width)"
    dtype = x.dtype

    # Fold each bias into its weight matrix as an extra trailing column.
    def pack(w, b):
        return jnp.concatenate([w, b[:, None]], axis=1).astype(dtype)

    w1a = pack(params["w1"], params["b1"])   # (DIM_HID, DIM_IN + 1)
    w2a = pack(params["w2"], params["b2"])   # (DIM_HID, DIM_HID + 1)
    w3a = pack(params["w3"], params["b3"])   # (DIM_OUT, DIM_HID + 1)

    # Don't burn a huge padded tile on tiny batches.
    batch_tile = min(batch_tile, 128 * pl.cdiv(n, 128))
    n_pad = batch_tile * pl.cdiv(n, batch_tile)

    # Feature-major (lane-dense) layout: batch rides on the 128-wide lane axis.
    xt = jnp.zeros((DIM_IN, n_pad), dtype).at[:, :n].set(x.T)

    grid = (n_pad // batch_tile,)
    rep = lambda a: pl.BlockSpec(a.shape, lambda i: (0, 0))   # resident params

    out_t = pl.pallas_call(
        mlp_kernel,
        out_shape=jax.ShapeDtypeStruct((DIM_OUT, n_pad), dtype),
        grid=grid,
        in_specs=[
            pl.BlockSpec((DIM_IN, batch_tile), lambda i: (0, i)),   # streamed X^T
            rep(w1a), rep(w2a), rep(w3a),
        ],
        out_specs=pl.BlockSpec((DIM_OUT, batch_tile), lambda i: (0, i)),
        compiler_params=pltpu.CompilerParams(
            dimension_semantics=("parallel",),       # shard batch across TCs on v7x
            vmem_limit_bytes=32 * 1024 * 1024,       # tiles are tiny; explicit cap anyway
        ),
    )(xt, w1a, w2a, w3a)

    return out_t[:, :n].T


def init_params(key):
    """Deterministic torch.nn.Linear-style init: U(-1/sqrt(fan_in), 1/sqrt(fan_in))."""
    def linear(key, fan_in, fan_out):
        kw, kb = jax.random.split(key)
        bound = 1.0 / jnp.sqrt(jnp.float32(fan_in))
        w = jax.random.uniform(kw, (fan_out, fan_in), jnp.float32, -bound, bound)
        b = jax.random.uniform(kb, (fan_out,), jnp.float32, -bound, bound)
        return w, b

    k1, k2, k3 = jax.random.split(key, 3)
    w1, b1 = linear(k1, DIM_IN, DIM_HID)
    w2, b2 = linear(k2, DIM_HID, DIM_HID)
    w3, b3 = linear(k3, DIM_HID, DIM_OUT)   # intended in-dim; see TODO(synk) above
    return {"w1": w1, "b1": b1, "w2": w2, "b2": b2, "w3": w3, "b3": b3}


def reference_forward(x, p):
    h = jax.nn.sigmoid(x @ p["w1"].T + p["b1"])
    h = jax.nn.sigmoid(h @ p["w2"].T + p["b2"])
    logits = h @ p["w3"].T + p["b3"]
    return jax.nn.softmax(logits, axis=-1)


if __name__ == "__main__":
    key = jax.random.PRNGKey(0)
    kx, kp = jax.random.split(key)

    batch = 300                      # deliberately NOT a multiple of any tile size
    x = jax.random.normal(kx, (batch, DIM_IN), jnp.float32)
    params = init_params(kp)

    out = jax.block_until_ready(nn_genre_classifier_forward(x, params))
    ref = reference_forward(x, params)

    assert out.shape == (batch, DIM_OUT)
    # Exact sigmoid + exact softmax normalization: only f32 rounding differences.
    assert jnp.allclose(out, ref, atol=1e-4, rtol=1e-4)
    assert jnp.allclose(jnp.sum(out, axis=-1), 1.0, atol=1e-4)

    # Multi-step grid path (3 tiles of 128 + padded tail) must agree with the
    # single-tile path.
    out_small_tile = jax.block_until_ready(
        nn_genre_classifier_forward(x, params, batch_tile=128))
    assert jnp.allclose(out, out_small_tile, atol=1e-5, rtol=1e-5)

    print("KERNEL_OK")
</pallas_src>

<mosaic_0001>
module attributes {stable_mosaic.version = 11 : i64} {
  func.func @mlp_kernel(%arg0: i32, %arg1: memref<11x384xf32, #tpu.memory_space<vmem>>, %arg2: memref<10x12xf32, #tpu.memory_space<vmem>>, %arg3: memref<10x11xf32, #tpu.memory_space<vmem>>, %arg4: memref<13x11xf32, #tpu.memory_space<vmem>>, %arg5: memref<13x384xf32, #tpu.memory_space<vmem>>) attributes {dimension_semantics = [#tpu.dimension_semantics<parallel>], iteration_bounds = array<i64: 1>, scalar_prefetch = 0 : i64, scratch_operands = 0 : i64, tpu.core_type = #tpu.core_type<tc>, window_params = [{transform_indices = @transform_0, window_bounds = array<i64: 11, 384>}, {pipeline_mode = #tpu.pipeline_mode<synchronous>, transform_indices = @transform_1, window_bounds = array<i64: 10, 12>}, {pipeline_mode = #tpu.pipeline_mode<synchronous>, transform_indices = @transform_2, window_bounds = array<i64: 10, 11>}, {pipeline_mode = #tpu.pipeline_mode<synchronous>, transform_indices = @transform_3, window_bounds = array<i64: 13, 11>}, {transform_indices = @transform_4, window_bounds = array<i64: 13, 384>}]} {
    %c0 = arith.constant 0 : index
    %c0_0 = arith.constant 0 : index
    %0 = vector.load %arg1[%c0, %c0_0] : memref<11x384xf32, #tpu.memory_space<vmem>>, vector<11x384xf32>
    %c0_1 = arith.constant 0 : index
    %c0_2 = arith.constant 0 : index
    %1 = vector.load %arg2[%c0_1, %c0_2] : memref<10x12xf32, #tpu.memory_space<vmem>>, vector<10x11xf32>
    %cst = arith.constant dense<0.000000e+00> : vector<10x384xf32>
    %2 = tpu.matmul %1, %0, %cst {dimension_numbers = #tpu.dot_dimension_numbers<[1], [0], [0], [1], [0, 0, 1, 1], [], []>} : vector<10x11xf32>, vector<11x384xf32>, vector<10x384xf32> -> vector<10x384xf32>
    %c0_3 = arith.constant 0 : index
    %c11 = arith.constant 11 : index
    %3 = vector.load %arg2[%c0_3, %c11] : memref<10x12xf32, #tpu.memory_space<vmem>>, vector<10x1xf32>
    %4 = vector.broadcast %3 : vector<10x1xf32> to vector<10x384xf32>
    %5 = arith.addf %2, %4 : vector<10x384xf32>
    %cst_4 = arith.constant 0.000000e+00 : f32
    %6 = vector.broadcast %cst_4 : f32 to vector<10x384xf32>
    %7 = arith.subf %6, %5 : vector<10x384xf32>
    %8 = math.exp %7 : vector<10x384xf32>
    %cst_5 = arith.constant 1.000000e+00 : f32
    %9 = vector.broadcast %cst_5 : f32 to vector<10x384xf32>
    %10 = arith.addf %9, %8 : vector<10x384xf32>
    %cst_6 = arith.constant 1.000000e+00 : f32
    %11 = vector.broadcast %cst_6 : f32 to vector<10x384xf32>
    %12 = arith.divf %11, %10 : vector<10x384xf32>
    %c0_7 = arith.constant 0 : index
    %c0_8 = arith.constant 0 : index
    %13 = vector.load %arg3[%c0_7, %c0_8] : memref<10x11xf32, #tpu.memory_space<vmem>>, vector<10x10xf32>
    %cst_9 = arith.constant dense<0.000000e+00> : vector<10x384xf32>
    %14 = tpu.matmul %13, %12, %cst_9 {dimension_numbers = #tpu.dot_dimension_numbers<[1], [0], [0], [1], [0, 0, 1, 1], [], []>} : vector<10x10xf32>, vector<10x384xf32>, vector<10x384xf32> -> vector<10x384xf32>
    %c0_10 = arith.constant 0 : index
    %c10 = arith.constant 10 : index
    %15 = vector.load %arg3[%c0_10, %c10] : memref<10x11xf32, #tpu.memory_space<vmem>>, vector<10x1xf32>
    %16 = vector.broadcast %15 : vector<10x1xf32> to vector<10x384xf32>
    %17 = arith.addf %14, %16 : vector<10x384xf32>
    %cst_11 = arith.constant 0.000000e+00 : f32
    %18 = vector.broadcast %cst_11 : f32 to vector<10x384xf32>
    %19 = arith.subf %18, %17 : vector<10x384xf32>
    %20 = math.exp %19 : vector<10x384xf32>
    %cst_12 = arith.constant 1.000000e+00 : f32
    %21 = vector.broadcast %cst_12 : f32 to vector<10x384xf32>
    %22 = arith.addf %21, %20 : vector<10x384xf32>
    %cst_13 = arith.constant 1.000000e+00 : f32
    %23 = vector.broadcast %cst_13 : f32 to vector<10x384xf32>
    %24 = arith.divf %23, %22 : vector<10x384xf32>
    %c0_14 = arith.constant 0 : index
    %c0_15 = arith.constant 0 : index
    %25 = vector.load %arg4[%c0_14, %c0_15] : memref<13x11xf32, #tpu.memory_space<vmem>>, vector<13x10xf32>
    %cst_16 = arith.constant dense<0.000000e+00> : vector<13x384xf32>
    %26 = tpu.matmul %25, %24, %cst_16 {dimension_numbers = #tpu.dot_dimension_numbers<[1], [0], [0], [1], [0, 0, 1, 1], [], []>} : vector<13x10xf32>, vector<10x384xf32>, vector<13x384xf32> -> vector<13x384xf32>
    %c0_17 = arith.constant 0 : index
    %c10_18 = arith.constant 10 : index
    %27 = vector.load %arg4[%c0_17, %c10_18] : memref<13x11xf32, #tpu.memory_space<vmem>>, vector<13x1xf32>
    %28 = vector.broadcast %27 : vector<13x1xf32> to vector<13x384xf32>
    %29 = arith.addf %26, %28 : vector<13x384xf32>
    %cst_19 = arith.constant dense<0xFF800000> : vector<384xf32>
    %30 = vector.multi_reduction <maximumf>, %29, %cst_19 [0] : vector<13x384xf32> to vector<384xf32>
    %31 = vector.shape_cast %30 : vector<384xf32> to vector<1x384xf32>
    %32 = vector.broadcast %31 : vector<1x384xf32> to vector<13x384xf32>
    %33 = arith.subf %29, %32 : vector<13x384xf32>
    %34 = math.exp %33 : vector<13x384xf32>
    %cst_20 = arith.constant dense<0.000000e+00> : vector<384xf32>
    %35 = vector.multi_reduction <add>, %34, %cst_20 [0] : vector<13x384xf32> to vector<384xf32>
    %36 = vector.shape_cast %35 : vector<384xf32> to vector<1x384xf32>
    %37 = vector.broadcast %36 : vector<1x384xf32> to vector<13x384xf32>
    %38 = arith.divf %34, %37 : vector<13x384xf32>
    %c0_21 = arith.constant 0 : index
    %c0_22 = arith.constant 0 : index
    %39 = vector.load %arg5[%c0_21, %c0_22] : memref<13x384xf32, #tpu.memory_space<vmem>>, vector<13x384xf32>
    tpu.vector_store %arg5[%c0_21, %c0_22], %38 {strides = array<i32>} : memref<13x384xf32, #tpu.memory_space<vmem>>, vector<13x384xf32>,
    return
  }
  func.func @transform_0(%arg0: i32) -> (i32, i32) {
    %c0_i32 = arith.constant 0 : i32
    %c0_i32_0 = arith.constant 0 : i32
    return %c0_i32, %arg0 : i32, i32
  }
  func.func @transform_1(%arg0: i32) -> (i32, i32) {
    %c0_i32 = arith.constant 0 : i32
    %c0_i32_0 = arith.constant 0 : i32
    %c0_i32_1 = arith.constant 0 : i32
    return %c0_i32, %c0_i32_0 : i32, i32
  }
  func.func @transform_2(%arg0: i32) -> (i32, i32) {
    %c0_i32 = arith.constant 0 : i32
    %c0_i32_0 = arith.constant 0 : i32
    %c0_i32_1 = arith.constant 0 : i32
    return %c0_i32, %c0_i32_0 : i32, i32
  }
  func.func @transform_3(%arg0: i32) -> (i32, i32) {
    %c0_i32 = arith.constant 0 : i32
    %c0_i32_0 = arith.constant 0 : i32
    %c0_i32_1 = arith.constant 0 : i32
    return %c0_i32, %c0_i32_0 : i32, i32
  }
  func.func @transform_4(%arg0: i32) -> (i32, i32) {
    %c0_i32 = arith.constant 0 : i32
    %c0_i32_0 = arith.constant 0 : i32
    return %c0_i32, %arg0 : i32, i32
  }
}

</mosaic_0001>

<bundles_post_ra>
// kernel: tpu_custom_call.1
= control target key start
LH: loop header
LB: loop body
LE: loop exit
PB: predicated region body
PF: predicated region fallthrough
CT: control target
= control target key end

     0   :  { %9 = vsyncpa [#allocation3], 0  ;;  %s1145_s0 = inlined_call_operand.hbm [shape: f32[11,384], index: 0, kind: input, shape index: {}]   ;;  %s1146_s1 = inlined_call_operand.hbm [shape: f32[10,12], index: 1, kind: input, shape index: {}]   ;;  %s1147_s2 = inlined_call_operand.hbm [shape: f32[10,11], index: 2, kind: input, shape index: {}]   ;;  %s1148_s3 = inlined_call_operand.hbm [shape: f32[13,11], index: 3, kind: input, shape index: {}]   ;;  %s1149_s4 = inlined_call_operand.hbm [shape: f32[13,384], index: 4, kind: output, shape index: {}]  }
   0x1   :  { %10 = vsyncpa [#allocation6], 0 }
   0x2   :  { %11 = vsyncpa [#allocation9], 0 }
   0x3   :  { %12 = vsyncpa [#allocation4], 0  ;;  %s1030_s15 = smov [#allocation5]  }
   0x4   :  { %s30_s16 = sshll.u32 %s1030_s15, 4  ;;  %s31_s16 = int_to_ptr.vmem [resolvable:$true] %s30_s16 }
   0x5   :  { %s930_s17 = scalar_lea.vmem %s31_s16, 256  ;;  %p935_p1 = scmp.lt.s32.totalorder %s31_s16, %s31_s16 }
   0x6   :  { %p931_p0 = scmp.ne.s32.totalorder %s31_s16, %s930_s17  ;;  %p936_p2 = scmp.lt.s32.totalorder %s930_s17, %s930_s17 }
   0x8   :  { %p937_p3 = por %p936_p2, %p935_p1 }
   0xa   :  { %p938_p4 = pnand %p937_p3, %p931_p0 }
   0xc   :  { %941 = shalt.err (!%p938_p4)
}
   0xd   :  { %s1031_s18 = smov 128   ;;  %s1032_s19 = smov 8  }
   0xe   :  { %36 = dma.hbm_to_vmem [thread:$0]  %s1146_s1, 256, %s31_s16, [#allocation6], %s1031_s18, %s1031_s18, %s1032_s19  }
   0xf   :  { %s1033_s22 = smov [#allocation2]  }
  0x10   :  { %s18_s23 = sshll.u32 %s1033_s22, 4  ;;  %s19_s23 = int_to_ptr.vmem [resolvable:$true] %s18_s23 }
  0x11   :  { %s950_s24 = scalar_lea.vmem %s19_s23, 768  ;;  %p955_p6 = scmp.lt.s32.totalorder %s19_s23, %s19_s23 }
  0x12   :  { %p951_p5 = scmp.ne.s32.totalorder %s19_s23, %s950_s24  ;;  %p956_p7 = scmp.lt.s32.totalorder %s950_s24, %s950_s24 }
  0x14   :  { %p957_p8 = por %p956_p7, %p955_p6 }
  0x16   :  { %p958_p9 = pnand %p957_p8, %p951_p5 }
  0x18   :  { %961 = shalt.err (!%p958_p9)
}
  0x19   :  { %s1034_s25 = smov 384   ;;  %s1035_s26 = smov 24  }
  0x1a   :  { %24 = dma.hbm_to_vmem [thread:$0]  %s1145_s0, 768, %s19_s23, [#allocation3], %s1034_s25, %s1034_s25, %s1035_s26  }
  0x1b   :  { %s1036_s1 = smov [#allocation7]   ;;  %s1037_s30 = smov [#allocation8]  }
  0x1c   :  { %s42_s29 = sshll.u32 %s1036_s1, 4  ;;  %s54_s5 = sshll.u32 %s1037_s30, 4  ;;  %s43_s29 = int_to_ptr.vmem [resolvable:$true] %s42_s29  ;;  %s55_s5 = int_to_ptr.vmem [resolvable:$true] %s54_s5 }
  0x1d   :  { %s970_s6 = scalar_lea.vmem %s43_s29, 256  ;;  %p975_p11 = scmp.lt.s32.totalorder %s43_s29, %s43_s29 }
  0x1e   :  { %p971_p10 = scmp.ne.s32.totalorder %s43_s29, %s970_s6  ;;  %p976_p12 = scmp.lt.s32.totalorder %s970_s6, %s970_s6 }
  0x20   :  { %p977_p13 = por %p976_p12, %p975_p11 }
  0x22   :  { %p978_p0 = pnand %p977_p13, %p971_p10 }
  0x24   :  { %981 = shalt.err (!%p978_p0)
}
  0x25   :  { %48 = dma.hbm_to_vmem [thread:$0]  %s1147_s2, 256, %s43_s29, [#allocation6], %s1031_s18, %s1031_s18, %s1032_s19  }
  0x26   :  { %s990_s0 = scalar_lea.vmem %s55_s5, 256  ;;  %p995_p2 = scmp.lt.s32.totalorder %s55_s5, %s55_s5 }
  0x27   :  { %p991_p1 = scmp.ne.s32.totalorder %s55_s5, %s990_s0  ;;  %p996_p3 = scmp.lt.s32.totalorder %s990_s0, %s990_s0 }
  0x29   :  { %p997_p4 = por %p996_p3, %p995_p2 }
  0x2b   :  { %p998_p5 = pnand %p997_p4, %p991_p1 }
  0x2d   :  { %1001 = shalt.err (!%p998_p5)
}
  0x2e   :  { %60 = dma.hbm_to_vmem [thread:$0]  %s1148_s3, 256, %s55_s5, [#allocation9], %s1031_s18, %s1031_s18, %s1032_s19  }
  0x2f   :  { %1022 = dma.done.wait [#allocation3], 768  }
  0x30   :  { %1023 = vsyncadd [#allocation3], 4294966528 }
  0x31   :  { %1024 = dma.done.wait [#allocation6], 512  }
  0x32   :  { %1025 = vsyncadd [#allocation6], 4294966784 }
  0x33   :  { %1026 = dma.done.wait [#allocation9], 256  }
  0x34   :  { %1027 = vsyncadd [#allocation9], 4294967040  ;;  %v1038_v0 = vmov 0.0   ;;  %v1039_v1 = vmov 11   ;;  %vm96_vm0 = vcmask 1042432   ;;  %v74_v5 = vld [vmem:[#allocation2 + $0x8] sm:$0xff] }
  0x35   :  { %170 = vmatprep.mubr.f32.mxu0 %v1038_v0  ;;  %853 = vset.pattern.permute.xlu0 %v1039_v1  ;;  %v77_v2 = vld [vmem:[#allocation2 + $0x20] sm:$0x7]  ;;  %v78_v3 = vld [vmem:[#allocation2 + $0x28] sm:$0x7]  ;;  %v76_v4 = vld [vmem:[#allocation2 + $0x18] sm:$0x7] }
  0x36   :  { %787 = vmatprep.subr.msk.mxu0 %vm96_vm0, %v77_v2  ;;  %820 = vmatprep.subr.msk.mxu1 %vm96_vm0, %v78_v3  ;;  %v75_v6 = vld [vmem:[#allocation2 + $0x10] sm:$0xff]  ;;  %v73_v7 = vld [vmem:[#allocation2] sm:$0xff]  ;;  %vm91_vm1 = vcmask 89088   ;;  %v80_v9 = vld [vmem:[#allocation5 + $0x8] sm:$0x3]  ;;  %vm306_vm2 = vcmask 80896  }
  0x37   :  { %788 = vmatpush1.msk.msra.mxu0 %vm96_vm0, %v76_v4  ;;  %821 = vmatpush3.msk.msra.mxu1 %vm96_vm0, %v78_v3  ;;  %v79_v8 = vld [vmem:[#allocation5] sm:$0xff]  ;;  %v1094_v10 = vld [vmem:[#allocation7] sm:$0xff]  ;;  %v1098_v11 = vld [vmem:[#allocation7 + $0x8] sm:$0x3]  ;;  %v1040_v12 = vmov 10   ;;  %vm311_vm3 = vcmask 1041408  }
  0x38   :  { %136 = vmatprep.subr.mxu0 %v74_v5  ;;  %822 = vmatprep.subr.mxu1 %v75_v6  ;;  %v1102_v13 = vld [vmem:[#allocation8] sm:$0xff]  ;;  %v1119_v58 = vld [vmem:[#allocation8 + $0x8] sm:$0x1f]  ;;  %vm686_vm4 = vcmask 1044480   ;;  %s1041_s2 = smov [#allocation10]  }
  0x39   :  { %137 = vmatpush1.msra.mxu0 %v73_v7  ;;  %823 = vmatpush3.msra.mxu1 %v75_v6  ;;  %s773_s3 = sshll.u32 %s1041_s2, 4  ;;  %s774_s3 = int_to_ptr.vmem [resolvable:$true] %s773_s3 }
  0x3a   :  { %824 = vmatprep.mubr.msk.f32.mxu1 %vm91_vm1, %v79_v8  ;;  %789 = vmatmul.mubr.msk.f32.vlgmr.msra.gmra.mxu0 %vm91_vm1, %v79_v8  ;;  %s1002_s11 = scalar_lea.vmem %s774_s3, 768  ;;  %p1007_p7 = scmp.lt.s32.totalorder %s774_s3, %s774_s3 }
  0x3b   :  { %825 = vmatmul.mubr.msk.f32.vlgmr.msra.gmra.mxu1 %vm91_vm1, %v80_v9  ;;  %176 = vmatprep.mubr.f32.mxu0 %v1038_v0  ;;  %p1003_p6 = scmp.ne.s32.totalorder %s774_s3, %s1002_s11  ;;  %p1008_p8 = scmp.lt.s32.totalorder %s1002_s11, %s1002_s11 }
  0x3c   :  { %88 = vperm.xlu0 %853, %v80_v9   ;;  %385 = vmatprep.mubr.f32.mxu1 %v1038_v0 }
  0x3d   :  { %854 = vset.pattern.permute.xlu1 %v1040_v12  ;;  %p1009_p9 = por %p1008_p8, %p1007_p7 }
  0x3e   :  { %790 = vmatmul.mubr.msk.f32.gmra.mxu0 %vm91_vm1, %v80_v9  ;;  %303 = vperm.xlu1 %854, %v1098_v11  }
  0x3f   :  { %831 = vmatprep.mubr.msk.f32.mxu0 %vm306_vm2, %v1094_v10  ;;  %p1010_p10 = pnand %p1009_p9, %p1003_p6 }
  0x40   :  { %83 = vperm.xlu0 %853, %v79_v8  }
  0x42   :  { %298 = vperm.xlu1 %854, %v1094_v10  }
  0x44   :  { %855 = vset.pattern.permute.xlu0 %v1040_v12 }
  0x45   :  { %518 = vperm.xlu0 %855, %v1119_v58  }
  0x46   :  { %513 = vperm.xlu1 %854, %v1102_v13  }
  0xb7   :  { %v89_v14 = vpop.permute.xlu0 %88 }
  0xb9   :  { %v304_v59 = vpop.permute.xlu1 %303 }
  0xbb   :  { %v84_v15 = vpop.permute.xlu0 %83 }
  0xbd   :  { %v299_v61 = vpop.permute.xlu1 %298 }
  0xfa   :  { %v172_v16 = vpop.f32.mrf.mxu0 }
  0xfb   :  { %v173_v17 = vadd.f32 %v172_v16, %v84_v15  ;;  %v826_v18 = vpop.f32.mrf.mxu1 }
  0xfc   :  { %v255_v19 = vadd.f32 %v826_v18, %v89_v14  ;;  %v174_v20 = vpop.f32.mrf.mxu0 }
  0xfd   :  { %v175_v21 = vadd.f32 %v174_v20, %v84_v15  ;;  %v249_v22 = vpop.f32.mrf.mxu1  ;;  %v258_v23 = vsub.f32 0.0, %v173_v17 }
  0xfe   :  { %v263_v24 = vsub.f32 0.0, %v255_v19  ;;  %v250_v25 = vadd.f32 %v249_v22, %v84_v15  ;;  %v178_v26 = vpop.f32.mrf.mxu0 }
  0xff   :  { %v259_v27 = vsub.f32 0.0, %v175_v21  ;;  %v179_v28 = vadd.f32 %v178_v26, %v89_v14  ;;  %v264_v35 = vmul.f32 1.442695, %v258_v23 }
 0x100   :  { %v274_v29 = vmul.f32 1.442695, %v263_v24  ;;  %v260_v30 = vsub.f32 0.0, %v250_v25  ;;  %v180_v31 = vpop.f32.mrf.mxu0 }
 0x101   :  { %v266_v32 = vmul.f32 1.442695, %v259_v27  ;;  %v261_v33 = vsub.f32 0.0, %v179_v28  ;;  %v181_v34 = vadd.f32 %v180_v31, %v89_v14 }
 0x102   :  { %856 = vpow2.f32 %v274_v29  ;;  %v268_v36 = vmul.f32 1.442695, %v260_v30 }
 0x103   :  { %858 = vpow2.f32 %v266_v32  ;;  %v270_v37 = vmul.f32 1.442695, %v261_v33  ;;  %v262_v38 = vsub.f32 0.0, %v181_v34 }
 0x104   :  { %860 = vpow2.f32 %v268_v36 }
 0x105   :  { %862 = vpow2.f32 %v270_v37  ;;  %v272_v39 = vmul.f32 1.442695, %v262_v38 }
 0x106   :  { %864 = vpow2.f32 %v264_v35 }
 0x107   :  { %866 = vpow2.f32 %v272_v39 }
 0x10f   :  { %v857_v40 = vpop.eup %856 }
 0x110   :  { %v859_v41 = vpop.eup %858  ;;  %v281_v42 = vadd.f32 1.0, %v857_v40 }
 0x111   :  { %v861_v43 = vpop.eup %860  ;;  %v277_v49 = vadd.f32 1.0, %v859_v41  ;;  %v519_v41 = vpop.permute.xlu0 %518 }
 0x112   :  { %v863_v44 = vpop.eup %862  ;;  %868 = vrcp.f32 %v281_v42  ;;  %v278_v45 = vadd.f32 1.0, %v861_v43 }
 0x113   :  { %v865_v46 = vpop.eup %864  ;;  %v279_v48 = vadd.f32 1.0, %v863_v44  ;;  %v514_v44 = vpop.permute.xlu1 %513 }
 0x114   :  { %v867_v47 = vpop.eup %866  ;;  %870 = vrcp.f32 %v278_v45  ;;  %v276_v51 = vadd.f32 1.0, %v865_v46 }
 0x115   :  { %v280_v50 = vadd.f32 1.0, %v867_v47 }
 0x117   :  { %872 = vrcp.f32 %v280_v50 }
 0x118   :  { %874 = vrcp.f32 %v279_v48 }
 0x119   :  { %876 = vrcp.f32 %v277_v49 }
 0x11a   :  { %878 = vrcp.f32 %v276_v51 }
 0x11f   :  { %v869_v52 = vpop.eup %868 }
 0x120   :  { %827 = vmatprep.subr.msk.mxu0 %vm311_vm3, %v869_v52 }
 0x121   :  { %v871_v53 = vpop.eup %870  ;;  %828 = vmatpush3.msk.msra.mxu0 %vm311_vm3, %v869_v52 }
 0x122   :  { %829 = vmatprep.subr.mxu0 %v871_v53 }
 0x123   :  { %830 = vmatpush3.msra.mxu0 %v871_v53 }
 0x124   :  { %v873_v54 = vpop.eup %872  ;;  %832 = vmatmul.mubr.msk.f32.vlgmr.msra.gmra.mxu0 %vm306_vm2, %v1098_v11 }
 0x125   :  { %v875_v55 = vpop.eup %874  ;;  %794 = vmatprep.subr.msk.mxu1 %vm311_vm3, %v873_v54  ;;  %598 = vmatprep.mubr.f32.mxu0 %v1038_v0 }
 0x126   :  { %v877_v56 = vpop.eup %876  ;;  %795 = vmatpush1.msk.msra.mxu1 %vm311_vm3, %v875_v55 }
 0x127   :  { %v879_v57 = vpop.eup %878  ;;  %351 = vmatprep.subr.mxu1 %v877_v56 }
 0x128   :  { %352 = vmatpush1.msra.mxu1 %v879_v57 }
 0x129   :  { %796 = vmatmul.mubr.msk.f32.vlgmr.msra.gmra.mxu1 %vm306_vm2, %v1094_v10 }
 0x12a   :  { %391 = vmatprep.mubr.f32.mxu1 %v1038_v0 }
 0x12d   :  { %797 = vmatmul.mubr.msk.f32.gmra.mxu1 %vm306_vm2, %v1098_v11 }
 0x12e   :  { %838 = vmatprep.mubr.msk.f32.mxu1 %vm306_vm2, %v1102_v13 }
 0x1e4   :  { %v833_v60 = vpop.f32.mrf.mxu0 }
 0x1e5   :  { %v470_v62 = vadd.f32 %v833_v60, %v304_v59 }
 0x1e6   :  { %v464_v63 = vpop.f32.mrf.mxu0 }
 0x1e7   :  { %v478_v1 = vsub.f32 0.0, %v470_v62  ;;  %v465_v2 = vadd.f32 %v464_v63, %v299_v61 }
 0x1e9   :  { %v489_v3 = vmul.f32 1.442695, %v478_v1  ;;  %v475_v4 = vsub.f32 0.0, %v465_v2  ;;  %v387_v5 = vpop.f32.mrf.mxu1 }
 0x1ea   :  { %v388_v6 = vadd.f32 %v387_v5, %v299_v61 }
 0x1eb   :  { %880 = vpow2.f32 %v489_v3  ;;  %v483_v7 = vmul.f32 1.442695, %v475_v4  ;;  %v389_v8 = vpop.f32.mrf.mxu1 }
 0x1ec   :  { %v390_v9 = vadd.f32 %v389_v8, %v299_v61  ;;  %v473_v10 = vsub.f32 0.0, %v388_v6 }
 0x1ed   :  { %882 = vpow2.f32 %v483_v7  ;;  %v393_v11 = vpop.f32.mrf.mxu1 }
 0x1ee   :  { %v474_v12 = vsub.f32 0.0, %v390_v9  ;;  %v394_v14 = vadd.f32 %v393_v11, %v304_v59  ;;  %v479_v19 = vmul.f32 1.442695, %v473_v10 }
 0x1ef   :  { %v395_v15 = vpop.f32.mrf.mxu1 }
 0x1f0   :  { %v481_v16 = vmul.f32 1.442695, %v474_v12  ;;  %v476_v17 = vsub.f32 0.0, %v394_v14  ;;  %v396_v18 = vadd.f32 %v395_v15, %v304_v59 }
 0x1f2   :  { %v485_v20 = vmul.f32 1.442695, %v476_v17  ;;  %v477_v21 = vsub.f32 0.0, %v396_v18  ;;  %884 = vpow2.f32 %v481_v16 }
 0x1f4   :  { %886 = vpow2.f32 %v485_v20  ;;  %v487_v22 = vmul.f32 1.442695, %v477_v21 }
 0x1f5   :  { %888 = vpow2.f32 %v479_v19 }
 0x1f6   :  { %890 = vpow2.f32 %v487_v22 }
 0x1f8   :  { %v881_v23 = vpop.eup %880 }
 0x1f9   :  { %v496_v24 = vadd.f32 1.0, %v881_v23 }
 0x1fa   :  { %v883_v25 = vpop.eup %882 }
 0x1fb   :  { %892 = vrcp.f32 %v496_v24  ;;  %v493_v26 = vadd.f32 1.0, %v883_v25 }
 0x1fd   :  { %894 = vrcp.f32 %v493_v26 }
 0x1ff   :  { %v885_v27 = vpop.eup %884 }
 0x200   :  { %v492_v32 = vadd.f32 1.0, %v885_v27 }
 0x201   :  { %v887_v28 = vpop.eup %886 }
 0x202   :  { %v889_v29 = vpop.eup %888  ;;  %v494_v31 = vadd.f32 1.0, %v887_v28 }
 0x203   :  { %v891_v30 = vpop.eup %890  ;;  %v491_v34 = vadd.f32 1.0, %v889_v29 }
 0x204   :  { %v495_v33 = vadd.f32 1.0, %v891_v30 }
 0x206   :  { %896 = vrcp.f32 %v495_v33 }
 0x207   :  { %898 = vrcp.f32 %v494_v31 }
 0x208   :  { %v893_v35 = vpop.eup %892  ;;  %900 = vrcp.f32 %v492_v32 }
 0x209   :  { %902 = vrcp.f32 %v491_v34  ;;  %834 = vmatprep.subr.msk.mxu1 %vm311_vm3, %v893_v35 }
 0x20a   :  { %v895_v36 = vpop.eup %894  ;;  %835 = vmatpush3.msk.msra.mxu1 %vm311_vm3, %v893_v35 }
 0x20b   :  { %836 = vmatprep.subr.mxu1 %v895_v36 }
 0x20c   :  { %837 = vmatpush3.msra.mxu1 %v895_v36 }
 0x20d   :  { %839 = vmatmul.mubr.msk.f32.vlgmr.msra.gmra.mxu1 %vm306_vm2, %v1119_v58 }
 0x213   :  { %v897_v37 = vpop.eup %896 }
 0x214   :  { %v899_v38 = vpop.eup %898  ;;  %801 = vmatprep.subr.msk.mxu0 %vm311_vm3, %v897_v37 }
 0x215   :  { %v901_v39 = vpop.eup %900  ;;  %802 = vmatpush1.msk.msra.mxu0 %vm311_vm3, %v899_v38 }
 0x216   :  { %v903_v40 = vpop.eup %902  ;;  %564 = vmatprep.subr.mxu0 %v901_v39 }
 0x217   :  { %565 = vmatpush1.msra.mxu0 %v903_v40 }
 0x218   :  { %803 = vmatmul.mubr.msk.f32.vlgmr.msra.gmra.mxu0 %vm306_vm2, %v1102_v13 }
 0x219   :  { %604 = vmatprep.mubr.f32.mxu0 %v1038_v0 }
 0x21c   :  { %804 = vmatmul.mubr.msk.f32.gmra.mxu0 %vm306_vm2, %v1119_v58 }
 0x2cd   :  { %v840_v42 = vpop.f32.mrf.mxu1 }
 0x2ce   :  { %v683_v43 = vadd.f32 %v840_v42, %v519_v41 }
 0x2cf   :  { %v677_v45 = vpop.f32.mrf.mxu1 }
 0x2d0   :  { %v678_v46 = vadd.f32 %v677_v45, %v514_v44  ;;  %v703_v47 = vsel %vm686_vm4, %v683_v43, -inf }
 0x2d2   :  { %v704_v48 = vmax.f32 %v678_v46, %v703_v47 }
 0x2d4   :  { %v705_v49 = vrot.slane %v704_v48, 4 }
 0x2d6   :  { %v706_v50 = vmax.f32 %v704_v48, %v705_v49 }
 0x2d8   :  { %v707_v51 = vrot.slane %v706_v50, 2  ;;  %v600_v52 = vpop.f32.mrf.mxu0 }
 0x2d9   :  { %v601_v57 = vadd.f32 %v600_v52, %v514_v44 }
 0x2da   :  { %v708_v13 = vmax.f32 %v706_v50, %v707_v51  ;;  %v602_v53 = vpop.f32.mrf.mxu0 }
 0x2db   :  { %v603_v63 = vadd.f32 %v602_v53, %v514_v44 }
 0x2dc   :  { %v709_v0 = vrot.slane %v708_v13, 1  ;;  %v606_v54 = vpop.f32.mrf.mxu0 }
 0x2dd   :  { %v607_v55 = vadd.f32 %v606_v54, %v519_v41 }
 0x2de   :  { %v710_v56 = vmax.f32 %v708_v13, %v709_v0  ;;  %v608_v58 = vpop.f32.mrf.mxu0 }
 0x2df   :  { %v687_v59 = vsel %vm686_vm4, %v607_v55, -inf  ;;  %v609_v60 = vadd.f32 %v608_v58, %v519_v41 }
 0x2e0   :  { %v713_v61 = vsub.f32 %v678_v46, %v710_v56  ;;  %v716_v62 = vsub.f32 %v683_v43, %v710_v56  ;;  %v688_v1 = vmax.f32 %v601_v57, %v687_v59 }
 0x2e1   :  { %v695_v2 = vsel %vm686_vm4, %v609_v60, -inf }
 0x2e2   :  { %v721_v3 = vmul.f32 1.442695, %v713_v61  ;;  %v727_v4 = vmul.f32 1.442695, %v716_v62  ;;  %v689_v5 = vrot.slane %v688_v1, 4  ;;  %v696_v6 = vmax.f32 %v603_v63, %v695_v2 }
 0x2e4   :  { %904 = vpow2.f32 %v721_v3  ;;  %v690_v7 = vmax.f32 %v688_v1, %v689_v5  ;;  %v697_v8 = vrot.slane %v696_v6, 4 }
 0x2e5   :  { %906 = vpow2.f32 %v727_v4 }
 0x2e6   :  { %v691_v9 = vrot.slane %v690_v7, 2  ;;  %v698_v10 = vmax.f32 %v696_v6, %v697_v8 }
 0x2e8   :  { %v692_v11 = vmax.f32 %v690_v7, %v691_v9  ;;  %v699_v12 = vrot.slane %v698_v10, 2 }
 0x2ea   :  { %v693_v14 = vrot.slane %v692_v11, 1  ;;  %v700_v15 = vmax.f32 %v698_v10, %v699_v12 }
 0x2ec   :  { %v694_v16 = vmax.f32 %v692_v11, %v693_v14  ;;  %v701_v17 = vrot.slane %v700_v15, 1 }
 0x2ee   :  { %v711_v18 = vsub.f32 %v601_v57, %v694_v16  ;;  %v714_v19 = vsub.f32 %v607_v55, %v694_v16  ;;  %v702_v20 = vmax.f32 %v700_v15, %v701_v17 }
 0x2f0   :  { %v717_v21 = vmul.f32 1.442695, %v711_v18  ;;  %v723_v22 = vmul.f32 1.442695, %v714_v19  ;;  %v712_v23 = vsub.f32 %v603_v63, %v702_v20  ;;  %v715_v24 = vsub.f32 %v609_v60, %v702_v20 }
 0x2f1   :  { %v905_v25 = vpop.eup %904 }
 0x2f2   :  { %v907_v26 = vpop.eup %906  ;;  %908 = vpow2.f32 %v717_v21  ;;  %v719_v27 = vmul.f32 1.442695, %v712_v23  ;;  %v725_v28 = vmul.f32 1.442695, %v715_v24 }
 0x2f3   :  { %v745_v29 = vsel %vm686_vm4, %v907_v26, 0.0  ;;  %910 = vpow2.f32 %v723_v22 }
 0x2f4   :  { %v746_v30 = vadd.f32 %v905_v25, %v745_v29  ;;  %912 = vpow2.f32 %v719_v27 }
 0x2f5   :  { %914 = vpow2.f32 %v725_v28 }
 0x2f6   :  { %v747_v31 = vrot.slane %v746_v30, 4 }
 0x2f8   :  { %v748_v32 = vadd.f32 %v747_v31, %v746_v30 }
 0x2fa   :  { %v749_v33 = vrot.slane %v748_v32, 2 }
 0x2fc   :  { %v750_v34 = vadd.f32 %v749_v33, %v748_v32 }
 0x2fe   :  { %v751_v35 = vrot.slane %v750_v34, 1 }
 0x2ff   :  { %v909_v36 = vpop.eup %908 }
 0x300   :  { %v911_v37 = vpop.eup %910  ;;  %v752_v38 = vadd.f32 %v751_v35, %v750_v34 }
 0x301   :  { %v913_v39 = vpop.eup %912  ;;  %v729_v40 = vsel %vm686_vm4, %v911_v37, 0.0 }
 0x302   :  { %v915_v41 = vpop.eup %914  ;;  %916 = vrcp.f32 %v752_v38  ;;  %v730_v42 = vadd.f32 %v909_v36, %v729_v40 }
 0x303   :  { %v737_v43 = vsel %vm686_vm4, %v915_v41, 0.0 }
 0x304   :  { %v731_v44 = vrot.slane %v730_v42, 4  ;;  %v738_v45 = vadd.f32 %v913_v39, %v737_v43 }
 0x306   :  { %v732_v46 = vadd.f32 %v731_v44, %v730_v42  ;;  %v739_v47 = vrot.slane %v738_v45, 4 }
 0x308   :  { %v733_v48 = vrot.slane %v732_v46, 2  ;;  %v740_v49 = vadd.f32 %v739_v47, %v738_v45 }
 0x30a   :  { %v734_v50 = vadd.f32 %v733_v48, %v732_v46  ;;  %v741_v51 = vrot.slane %v740_v49, 2 }
 0x30c   :  { %v735_v52 = vrot.slane %v734_v50, 1  ;;  %v742_v13 = vadd.f32 %v741_v51, %v740_v49 }
 0x30e   :  { %v736_v53 = vadd.f32 %v735_v52, %v734_v50  ;;  %v743_v0 = vrot.slane %v742_v13, 1 }
 0x30f   :  { %v917_v54 = vpop.eup %916 }
 0x310   :  { %918 = vrcp.f32 %v736_v53  ;;  %v744_v55 = vadd.f32 %v743_v0, %v742_v13  ;;  %v758_v56 = vmul.f32 %v917_v54, %v905_v25  ;;  %v761_v57 = vmul.f32 %v917_v54, %v907_v26 }
 0x312   :  { %920 = vrcp.f32 %v744_v55  ;;  %764 = vst [vmem:[#allocation10 + $0x10] sm:$0xff] %v758_v56  ;;  %767 = vst [vmem:[#allocation10 + $0x28] sm:$0x1f] %v761_v57 }
 0x31d   :  { %v919_v58 = vpop.eup %918 }
 0x31e   :  { %v754_v59 = vmul.f32 %v919_v58, %v909_v36  ;;  %v759_v60 = vmul.f32 %v919_v58, %v911_v37 }
 0x31f   :  { %v921_v61 = vpop.eup %920 }
 0x320   :  { %v756_v62 = vmul.f32 %v921_v61, %v913_v39  ;;  %v760_v63 = vmul.f32 %v921_v61, %v915_v41  ;;  %762 = vst [vmem:[#allocation10] sm:$0xff] %v754_v59  ;;  %765 = vst [vmem:[#allocation10 + $0x18] sm:$0x1f] %v759_v60 }
 0x322   :  { %763 = vst [vmem:[#allocation10 + $0x8] sm:$0xff] %v756_v62  ;;  %766 = vst [vmem:[#allocation10 + $0x20] sm:$0x1f] %v760_v63 }
 0x323   :  { %1013 = shalt.err (!%p1010_p10)
}
 0x324   :  { %779 = dma.vmem_to_hbm [thread:$0]  %s774_s3, 768, %s1149_s4, [#allocation4], %s1034_s25, %s1034_s25, %s1035_s26  }
 0x325   :  { %1028 = dma.done.wait [#allocation4], 768  }
 0x326   :  { %1029 = vsyncadd [#allocation4], 4294966528 }
 0x327   :  { %783 = vsyncpa [#allocation3], 1 }
 0x328   :  { %784 = vsyncpa [#allocation6], 1 }
 0x329   :  { %785 = vsyncpa [#allocation9], 1 }
 0x32a   :  { %786 = vsyncpa [#allocation4], 1 }

</bundles_post_ra>
